<compile_context>
chip_gen: v5e
topology: v5e:2x2
jax: 0.10.0
libtpu: 0.0.40
codegen_flags: <defaults>
</compile_context>

<pallas_src>
import jax
import jax.numpy as jnp
from jax import lax
from jax.experimental import pallas as pl
from jax.experimental.pallas import tpu as pltpu

_MiB = 1 << 20


def _make_kernel(n_layers: int, compute_dtype):
    """Fused (Linear -> ReLU)*(n_layers-1) -> Linear -> squared-L2 kernel.

    Activations are carried as [features, TILE_B] (batch along TPU lanes)."""

    def kernel(x_ref, *refs):
        o_ref = refs[-1]
        params = refs[:-1]   # (w0, b0, w1, b1, ...); w in PyTorch [out, in] layout

        # Layer 0: W0 @ X_tile^T.  Both-minor-dims contraction is the same
        # q @ k^T pattern flash attention uses; Mosaic feeds it to the MXU
        # without an explicit per-step relayout of the X tile.
        x_tile = x_ref[...]                      # (TILE_B, in_len), compute_dtype
        w0 = params[0][...]                      # (h0, in_len),     compute_dtype
        b0 = params[1][...].astype(jnp.float32)  # (h0, 1), f32
        h = lax.dot_general(
            w0, x_tile,
            dimension_numbers=(((1,), (1,)), ((), ())),
            preferred_element_type=jnp.float32,
        ) + b0                                   # (h0, TILE_B), f32 accumulation

        # Remaining layers: ReLU (f32 on the VPU) then Linear on the MXU.
        for li in range(1, n_layers):
            w = params[2 * li][...]
            b = params[2 * li + 1][...].astype(jnp.float32)
            h = jnp.maximum(h, 0.0)
            h = jnp.dot(w, h.astype(compute_dtype),
                        preferred_element_type=jnp.float32) + b

        # Squared L2 norm per example: reduce over the feature (sublane) axis.
        # Result is (1, TILE_B): lane-dense -> unmasked full-lane stores.
        o_ref[...] = jnp.sum(h * h, axis=0, keepdims=True)

    return kernel


def _vmem_capacity_bytes() -> int:
    """Generation-aware physical VMEM size (64 MiB v7x, 128 MiB v5e/v6e)."""
    try:
        cap = int(pltpu.get_tpu_info().vmem_capacity_bytes)
        if cap <= 0:
            raise ValueError
        return cap
    except Exception:
        return 64 * _MiB     # safe lower bound across all generations


def latent_meta_loss(x, weights, biases, *, tile_b=4096,
                     compute_dtype=jnp.bfloat16):
    """x: [..., input_len] f32.  weights[i]: [out_i, in_i] (PyTorch layout),
    biases[i]: [out_i, 1].  Returns [..., 1] f32 = ||phi(x)||_2^2.

    compute_dtype controls the streamed X / weight dtype (bf16 by default for
    2x HBM + MXU rate); accumulation and the epilogue are always f32."""
    n_layers = len(weights)
    orig_lead = x.shape[:-1]
    in_len = x.shape[-1]
    x2 = x.reshape(-1, in_len)
    B = x2.shape[0]

    itemsize = jnp.dtype(compute_dtype).itemsize
    max_feat = max([in_len] + [int(w.shape[0]) for w in weights])
    param_bytes = (sum(int(w.size) * itemsize for w in weights)
                   + sum(int(b.size) * 4 for b in biases))

    def footprint(t):
        # Pallas double-buffers every input (including the constant-index
        # params) and the output; also charge the live f32 activation slab,
        # its compute-dtype cast copy and the h*h temporary as scratch
        # headroom for Mosaic.
        x_stream = 2 * t * in_len * itemsize
        out_stream = 2 * t * 4
        act_scratch = t * max_feat * (4 + 4 + itemsize)
        return 2 * param_bytes + x_stream + out_stream + act_scratch

    cap = _vmem_capacity_bytes()
    budget = int(0.70 * cap)

    # ---- derive TILE_B ------------------------------------------------------
    tb = min(int(tile_b), B)
    if B > 128:
        tb = max(128, (tb // 128) * 128)          # lane-dense output blocks
    # shrink to fit the generation-aware VMEM budget
    while tb > 128 and footprint(tb) > budget:
        tb = max(128, ((tb // 2) // 128) * 128)
    # v7x megacore balance: prefer >= 4 grid steps when the batch allows it
    while tb >= 2048 and pl.cdiv(B, tb) < 4:
        tb = max(1024, ((tb // 2) // 128) * 128)

    padded_B = pl.cdiv(B, tb) * tb
    num_tiles = padded_B // tb

    if padded_B != B:
        x2 = jnp.pad(x2, ((0, padded_B - B), (0, 0)))
    x2 = x2.astype(compute_dtype)                    # bf16 halves X HBM traffic
    ws = [w.astype(compute_dtype) for w in weights]  # bf16 halves weight traffic
    bs = [b.astype(jnp.float32) for b in biases]     # biases stay f32 (tiny)

    in_specs = [pl.BlockSpec((tb, in_len), lambda i: (i, 0))]
    operands = [x2]
    for w, b in zip(ws, bs):
        # Constant index maps -> DMA'd once, VMEM-resident across the grid.
        in_specs.append(pl.BlockSpec(w.shape, lambda i: (0, 0)))
        in_specs.append(pl.BlockSpec(b.shape, lambda i: (0, 0)))
        operands.extend([w, b])

    out_spec = pl.BlockSpec((1, tb), lambda i: (0, i))   # lane-dense output

    vmem_limit = int(min(int(0.90 * cap),
                         max(32 * _MiB, footprint(tb) + 8 * _MiB)))

    # Advisory cost hint so XLA schedules the surrounding pad/slice sensibly.
    flops = 2 * padded_B * sum(int(w.shape[0]) * int(w.shape[1]) for w in weights)
    flops += 2 * padded_B * int(weights[-1].shape[0])     # square + reduce
    bytes_accessed = padded_B * in_len * itemsize + param_bytes + padded_B * 4
    cost = pl.CostEstimate(flops=flops, transcendentals=0,
                           bytes_accessed=bytes_accessed)

    out = pl.pallas_call(
        _make_kernel(n_layers, compute_dtype),
        out_shape=jax.ShapeDtypeStruct((1, padded_B), jnp.float32),
        grid=(num_tiles,),
        in_specs=in_specs,
        out_specs=out_spec,
        compiler_params=pltpu.CompilerParams(
            dimension_semantics=("parallel",),   # megacore sharding on v7x
            vmem_limit_bytes=vmem_limit,
        ),
        cost_estimate=cost,
    )(*operands)

    return out[0, :B].reshape(orig_lead + (1,))


def init_params(key, input_len, hidden_dim, layers):
    """nn.Linear-style init (uniform +-1/sqrt(fan_in)).  Weights kept in PyTorch
    [out_features, in_features] layout; biases as [out_features, 1]."""
    weights, biases = [], []
    fan_ins = [input_len] + [hidden_dim] * (layers - 1)
    for fan_in in fan_ins:
        key, kw, kb = jax.random.split(key, 3)
        bound = 1.0 / float(fan_in) ** 0.5
        w = jax.random.uniform(kw, (hidden_dim, fan_in), jnp.float32, -bound, bound)
        b = jax.random.uniform(kb, (hidden_dim, 1), jnp.float32, -bound, bound)
        weights.append(w)
        biases.append(b)
    return weights, biases


def reference(x, weights, biases):
    h = x
    for li, (w, b) in enumerate(zip(weights, biases)):
        if li > 0:
            h = jnp.maximum(h, 0.0)
        h = jnp.dot(h, w.T) + b[:, 0]
    return jnp.sum(h * h, axis=-1, keepdims=True)


if __name__ == "__main__":
    # Small, 128-aligned demo shapes (feature dims aligned to the lane width).
    batch, input_len, hidden_dim, layers = 256, 128, 128, 3

    key = jax.random.PRNGKey(0)
    key, kx = jax.random.split(key)
    x = jax.random.normal(kx, (batch, input_len), jnp.float32)
    weights, biases = init_params(key, input_len, hidden_dim, layers)

    RTOL, ATOL = 2e-2, 2e-2

    # Reference inputs quantized to bf16 (matches the default streaming dtype).
    x_b = x.astype(jnp.bfloat16).astype(jnp.float32)
    w_b = [w.astype(jnp.bfloat16).astype(jnp.float32) for w in weights]

    # 1) Default bf16 streaming path, multi-tile grid (tile_b=128 -> 2 steps).
    out_bf = jax.block_until_ready(latent_meta_loss(x, weights, biases, tile_b=128))
    ref_bf = reference(x_b, w_b, biases)
    assert out_bf.shape == (batch, 1)
    assert jnp.allclose(out_bf, ref_bf, rtol=RTOL, atol=ATOL), \
        float(jnp.max(jnp.abs(out_bf - ref_bf)))

    # 2) f32 streaming path, default (large) tile -> single block.
    out_f32 = jax.block_until_ready(
        latent_meta_loss(x, weights, biases, compute_dtype=jnp.float32))
    ref_f32 = reference(x, weights, biases)
    assert out_f32.shape == (batch, 1)
    assert jnp.allclose(out_f32, ref_f32, rtol=RTOL, atol=ATOL), \
        float(jnp.max(jnp.abs(out_f32 - ref_f32)))

    # 3) Odd small batch (not a multiple of 8/128), default bf16 path.
    xs = x[:10]
    out_s = jax.block_until_ready(latent_meta_loss(xs, weights, biases))
    ref_s = reference(xs.astype(jnp.bfloat16).astype(jnp.float32), w_b, biases)
    assert out_s.shape == (10, 1)
    assert jnp.allclose(out_s, ref_s, rtol=RTOL, atol=ATOL)

    # 4) layers=1 (no ReLU, the PyTorch default), f32 path.
    w1, b1 = init_params(jax.random.PRNGKey(1), input_len, 64, 1)
    out_1 = jax.block_until_ready(
        latent_meta_loss(x, w1, b1, compute_dtype=jnp.float32))
    ref_1 = reference(x, w1, b1)
    assert out_1.shape == (batch, 1)
    assert jnp.allclose(out_1, ref_1, rtol=RTOL, atol=ATOL)

    print("KERNEL_OK")
</pallas_src>

<mosaic_0001>
module attributes {stable_mosaic.version = 11 : i64} {
  func.func @kernel(%arg0: i32, %arg1: memref<128x128xbf16, #tpu.memory_space<vmem>>, %arg2: memref<128x128xbf16, #tpu.memory_space<vmem>>, %arg3: memref<128x1xf32, #tpu.memory_space<vmem>>, %arg4: memref<128x128xbf16, #tpu.memory_space<vmem>>, %arg5: memref<128x1xf32, #tpu.memory_space<vmem>>, %arg6: memref<128x128xbf16, #tpu.memory_space<vmem>>, %arg7: memref<128x1xf32, #tpu.memory_space<vmem>>, %arg8: memref<1x128xf32, #tpu.memory_space<vmem>>) attributes {dimension_semantics = [#tpu.dimension_semantics<parallel>], iteration_bounds = array<i64: 2>, scalar_prefetch = 0 : i64, scratch_operands = 0 : i64, tpu.core_type = #tpu.core_type<tc>, window_params = [{transform_indices = @transform_0, window_bounds = array<i64: 128, 128>}, {pipeline_mode = #tpu.pipeline_mode<synchronous>, transform_indices = @transform_1, window_bounds = array<i64: 128, 128>}, {pipeline_mode = #tpu.pipeline_mode<synchronous>, transform_indices = @transform_2, window_bounds = array<i64: 128, 1>}, {pipeline_mode = #tpu.pipeline_mode<synchronous>, transform_indices = @transform_3, window_bounds = array<i64: 128, 128>}, {pipeline_mode = #tpu.pipeline_mode<synchronous>, transform_indices = @transform_4, window_bounds = array<i64: 128, 1>}, {pipeline_mode = #tpu.pipeline_mode<synchronous>, transform_indices = @transform_5, window_bounds = array<i64: 128, 128>}, {pipeline_mode = #tpu.pipeline_mode<synchronous>, transform_indices = @transform_6, window_bounds = array<i64: 128, 1>}, {transform_indices = @transform_7, window_bounds = array<i64: 1, 128>}]} {
    %c0 = arith.constant 0 : index
    %c0_0 = arith.constant 0 : index
    %0 = vector.load %arg1[%c0, %c0_0] : memref<128x128xbf16, #tpu.memory_space<vmem>>, vector<128x128xbf16>
    %c0_1 = arith.constant 0 : index
    %c0_2 = arith.constant 0 : index
    %1 = vector.load %arg2[%c0_1, %c0_2] : memref<128x128xbf16, #tpu.memory_space<vmem>>, vector<128x128xbf16>
    %c0_3 = arith.constant 0 : index
    %c0_4 = arith.constant 0 : index
    %2 = vector.load %arg3[%c0_3, %c0_4] : memref<128x1xf32, #tpu.memory_space<vmem>>, vector<128x1xf32>
    %cst = arith.constant dense<0.000000e+00> : vector<128x128xf32>
    %3 = tpu.matmul %1, %0, %cst {dimension_numbers = #tpu.dot_dimension_numbers<[1], [1], [0], [0], [0, 0, 1, 0], [], []>} : vector<128x128xbf16>, vector<128x128xbf16>, vector<128x128xf32> -> vector<128x128xf32>
    %4 = vector.broadcast %2 : vector<128x1xf32> to vector<128x128xf32>
    %5 = arith.addf %3, %4 : vector<128x128xf32>
    %c0_5 = arith.constant 0 : index
    %c0_6 = arith.constant 0 : index
    %6 = vector.load %arg4[%c0_5, %c0_6] : memref<128x128xbf16, #tpu.memory_space<vmem>>, vector<128x128xbf16>
    %c0_7 = arith.constant 0 : index
    %c0_8 = arith.constant 0 : index
    %7 = vector.load %arg5[%c0_7, %c0_8] : memref<128x1xf32, #tpu.memory_space<vmem>>, vector<128x1xf32>
    %cst_9 = arith.constant 0.000000e+00 : f32
    %8 = vector.broadcast %cst_9 : f32 to vector<128x128xf32>
    %9 = arith.maximumf %5, %8 : vector<128x128xf32>
    %10 = arith.truncf %9 : vector<128x128xf32> to vector<128x128xbf16>
    %cst_10 = arith.constant dense<0.000000e+00> : vector<128x128xf32>
    %11 = tpu.matmul %6, %10, %cst_10 {dimension_numbers = #tpu.dot_dimension_numbers<[1], [0], [0], [1], [0, 0, 1, 1], [], []>} : vector<128x128xbf16>, vector<128x128xbf16>, vector<128x128xf32> -> vector<128x128xf32>
    %12 = vector.broadcast %7 : vector<128x1xf32> to vector<128x128xf32>
    %13 = arith.addf %11, %12 : vector<128x128xf32>
    %c0_11 = arith.constant 0 : index
    %c0_12 = arith.constant 0 : index
    %14 = vector.load %arg6[%c0_11, %c0_12] : memref<128x128xbf16, #tpu.memory_space<vmem>>, vector<128x128xbf16>
    %c0_13 = arith.constant 0 : index
    %c0_14 = arith.constant 0 : index
    %15 = vector.load %arg7[%c0_13, %c0_14] : memref<128x1xf32, #tpu.memory_space<vmem>>, vector<128x1xf32>
    %cst_15 = arith.constant 0.000000e+00 : f32
    %16 = vector.broadcast %cst_15 : f32 to vector<128x128xf32>
    %17 = arith.maximumf %13, %16 : vector<128x128xf32>
    %18 = arith.truncf %17 : vector<128x128xf32> to vector<128x128xbf16>
    %cst_16 = arith.constant dense<0.000000e+00> : vector<128x128xf32>
    %19 = tpu.matmul %14, %18, %cst_16 {dimension_numbers = #tpu.dot_dimension_numbers<[1], [0], [0], [1], [0, 0, 1, 1], [], []>} : vector<128x128xbf16>, vector<128x128xbf16>, vector<128x128xf32> -> vector<128x128xf32>
    %20 = vector.broadcast %15 : vector<128x1xf32> to vector<128x128xf32>
    %21 = arith.addf %19, %20 : vector<128x128xf32>
    %22 = arith.mulf %21, %21 : vector<128x128xf32>
    %cst_17 = arith.constant dense<0.000000e+00> : vector<128xf32>
    %23 = vector.multi_reduction <add>, %22, %cst_17 [0] : vector<128x128xf32> to vector<128xf32>
    %24 = vector.shape_cast %23 : vector<128xf32> to vector<1x128xf32>
    %c0_18 = arith.constant 0 : index
    %c0_19 = arith.constant 0 : index
    %25 = vector.load %arg8[%c0_18, %c0_19] : memref<1x128xf32, #tpu.memory_space<vmem>>, vector<1x128xf32>
    tpu.vector_store %arg8[%c0_18, %c0_19], %24 {strides = array<i32>} : memref<1x128xf32, #tpu.memory_space<vmem>>, vector<1x128xf32>,
    return
  }
  func.func @transform_0(%arg0: i32) -> (i32, i32) {
    %c0_i32 = arith.constant 0 : i32
    %c0_i32_0 = arith.constant 0 : i32
    return %arg0, %c0_i32 : i32, i32
  }
  func.func @transform_1(%arg0: i32) -> (i32, i32) {
    %c0_i32 = arith.constant 0 : i32
    %c0_i32_0 = arith.constant 0 : i32
    %c0_i32_1 = arith.constant 0 : i32
    return %c0_i32, %c0_i32_0 : i32, i32
  }
  func.func @transform_2(%arg0: i32) -> (i32, i32) {
    %c0_i32 = arith.constant 0 : i32
    %c0_i32_0 = arith.constant 0 : i32
    %c0_i32_1 = arith.constant 0 : i32
    return %c0_i32, %c0_i32_0 : i32, i32
  }
  func.func @transform_3(%arg0: i32) -> (i32, i32) {
    %c0_i32 = arith.constant 0 : i32
    %c0_i32_0 = arith.constant 0 : i32
    %c0_i32_1 = arith.constant 0 : i32
    return %c0_i32, %c0_i32_0 : i32, i32
  }
  func.func @transform_4(%arg0: i32) -> (i32, i32) {
    %c0_i32 = arith.constant 0 : i32
    %c0_i32_0 = arith.constant 0 : i32
    %c0_i32_1 = arith.constant 0 : i32
    return %c0_i32, %c0_i32_0 : i32, i32
  }
  func.func @transform_5(%arg0: i32) -> (i32, i32) {
    %c0_i32 = arith.constant 0 : i32
    %c0_i32_0 = arith.constant 0 : i32
    %c0_i32_1 = arith.constant 0 : i32
    return %c0_i32, %c0_i32_0 : i32, i32
  }
  func.func @transform_6(%arg0: i32) -> (i32, i32) {
    %c0_i32 = arith.constant 0 : i32
    %c0_i32_0 = arith.constant 0 : i32
    %c0_i32_1 = arith.constant 0 : i32
    return %c0_i32, %c0_i32_0 : i32, i32
  }
  func.func @transform_7(%arg0: i32) -> (i32, i32) {
    %c0_i32 = arith.constant 0 : i32
    %c0_i32_0 = arith.constant 0 : i32
    return %c0_i32, %arg0 : i32, i32
  }
}

</mosaic_0001>

<bundles_post_ra>
// kernel: tpu_custom_call.1
= control target key start
LH: loop header
LB: loop body
LE: loop exit
PB: predicated region body
PF: predicated region fallthrough
CT: control target
= control target key end

     0   :  { %12 = vsyncpa [#allocation3], 0  ;;  %s1772_s0 = inlined_call_operand.vmem [shape: bf16[256,128], index: 0, kind: input, shape index: {}]   ;;  %s1773_s1 = inlined_call_operand.vmem [shape: bf16[128,128], index: 1, kind: input, shape index: {}]   ;;  %s1774_s2 = inlined_call_operand.vmem [shape: f32[128,1], index: 2, kind: input, shape index: {}]   ;;  %s1775_s3 = inlined_call_operand.vmem [shape: bf16[128,128], index: 3, kind: input, shape index: {}]   ;;  %s1776_s4 = inlined_call_operand.vmem [shape: f32[128,1], index: 4, kind: input, shape index: {}]   ;;  %s1777_s5 = inlined_call_operand.vmem [shape: bf16[128,128], index: 5, kind: input, shape index: {}]   ;;  %s1778_s6 = inlined_call_operand.vmem [shape: f32[128,1], index: 6, kind: input, shape index: {}]   ;;  %s1779_s7 = inlined_call_operand.hbm [shape: f32[1,256], index: 7, kind: output, shape index: {}]  }
   0x1   :  { %14 = vsyncpa [#allocation3 + $0x1], 0  ;;  %s1455_s24 = smov 0   ;;  %s1457_s25 = smov 0  }
   0x2   :  { %s1459_s26 = smov 0   ;;  %s1461_s27 = smov 0  }
   0x3 LB: > { %s1476_s28 = sadd.s32 4294967295, %s1412_s27   ;;  %s1123_s29 = sadd.s32 4294967294, %s1412_s27   ;;  %s1412_s27 = sphi %s1461_s27, %s1785_s27   ;;  %s1408_s26 = sphi %s1459_s26, %s1784_s26   ;;  %s1404_s25 = sphi %s1457_s25, %s1783_s25   ;;  %s1400_s24 = sphi %s1455_s24, %s1782_s24  }
   0x4   : > { %s1480_s30 = sadd.s32 1, %s1412_s27   ;;  %s179_s8 = sadd.s32 1, %s1408_s26 }
   0x5   : > { %s176_s9 = ssub.s32 %s1412_s27, %s1480_s30  ;;  %p189_p0 = scmp.ne.s32.totalorder %s1408_s26, %s1404_s25 }
   0x6   : > { %p177_p1 = scmp.eq.s32.totalorder %s176_s9, 0  ;;  %p190_p2 = scmp.eq.s32.totalorder %s1476_s28, 1 }
   0x7   : > { %p195_p3 = scmp.ne.s32.totalorder %s1404_s25, %s1400_s24  ;;  %p196_p4 = scmp.eq.s32.totalorder %s1123_s29, 1 }
   0x8   : > { %s1491_s10 = scalar_select %p177_p1, %s1408_s26, %s179_s8  }
   0x9   : > { %p1493_p5 = por %p190_p2, %p189_p0  ;;  %p1497_p6 = por %p196_p4, %p195_p3 }
   0xa   : > { %p1126_p7 = scmp.ge.s32.totalorder %s1412_s27, 1  ;;  %p241_p8 = scmp.lt.s32.totalorder %s1412_s27, 3 }
   0xc   : > { %p242_p9 = pnand %p1126_p7, %p241_p8 }
   0xd   : > { %s1127_s13 = sshll.u32 (!%p242_p9), %s1476_s28, 4  ;;  %s270_s8 = sand.u32 (!%p242_p9), 1, %s1404_s25  }
   0xe   : > { %245 = sbr.rel (%p242_p9) target bundleno = 845 (0x34d), region = 48  ;;  %p273_p10 = scmp.lt.s32.totalorder (!%p242_p9), %s1127_s13, 31 }
   0xf   : > { %s1064_s14 = scalar_lea.hbm (!%p242_p9), %s1779_s7, %s1476_s28  ;;  %s271_s15 = scalar_lea.vmem (!%p242_p9), [#allocation2], %s270_s8 }
  0x10   : > { %s1066_s16 = sshll.u32 (!%p242_p9), %s271_s15, 4  ;;  %s1068_s17 = sshll.u32 (!%p242_p9), %s1064_s14, 4  ;;  %s1067_s16 = int_to_ptr.vmem [resolvable:$true] %s1066_s16  ;;  %s1069_s17 = int_to_ptr.hbm [resolvable:$true] %s1068_s17 }
  0x11   : > { %s1370_s28 = scalar_lea.hbm (!%p242_p9), %s1779_s7, 2 }
  0x13   : > { %v324_v0 = vld [vmem:[%s1774_s2 + $0x70] sm:$0xff]  ;;  %v322_v1 = vld [vmem:[%s1774_s2 + $0x60] sm:$0xff]  ;;  %v1414_v2 = vmov 0   ;;  %s1787_s13 = smov (!%p273_p10, %s1127_s13), 31  ;;  %v325_v4 = vld [vmem:[%s1774_s2 + $0x78] sm:$0xff] }
  0x14   : > { %1347 = vset.pattern.permute.xlu0 %v1414_v2  ;;  %1348 = vset.pattern.permute.xlu1 %v1414_v2  ;;  %s1128_s18 = sshll.u32 %s1787_s13, 2  ;;  %v323_v5 = vld [vmem:[%s1774_s2 + $0x68] sm:$0xff]  ;;  %v320_v6 = vld [vmem:[%s1774_s2 + $0x50] sm:$0xff]  ;;  %v318_v8 = vld [vmem:[%s1774_s2 + $0x40] sm:$0xff] }
  0x15   : > { %398 = vperm.xlu0 %1347, %v324_v0   ;;  %388 = vperm.xlu1 %1348, %v322_v1   ;;  %s1513_s21 = scalar_lea.vmem %s1772_s0, %s1128_s18  ;;  %v319_v9 = vld [vmem:[%s1774_s2 + $0x48] sm:$0xff]  ;;  %v321_v10 = vld [vmem:[%s1774_s2 + $0x58] sm:$0xff]  ;;  %v314_v13 = vld [vmem:[%s1774_s2 + $0x20] sm:$0xff]  ;;  %s1056_s18 = scalar_lea.sflag [#allocation3], %s270_s8 }
  0x16   : > { %1349 = vset.pattern.permute.xlu2 %v1414_v2  ;;  %v1266_v3 = vld [vmem:[%s1513_s21 + $0x38] sm:$0xff]  ;;  %v1265_v7 = vld [vmem:[%s1513_s21 + $0x30] sm:$0xff]  ;;  %v1264_v11 = vld [vmem:[%s1513_s21 + $0x28] sm:$0xff] }
  0x17   : > { %502 = vmatpush.bf16.xpose.msra.mxu0 %v1266_v3  ;;  %1291 = vmatpush.bf16.xpose.msra.mxu3 %v1266_v3  ;;  %v317_v12 = vld [vmem:[%s1774_s2 + $0x38] sm:$0xff]  ;;  %v316_v14 = vld [vmem:[%s1774_s2 + $0x30] sm:$0xff]  ;;  %v1263_v15 = vld [vmem:[%s1513_s21 + $0x20] sm:$0xff] }
  0x18   : > { %378 = vperm.xlu2 %1349, %v320_v6   ;;  %v312_v16 = vld [vmem:[%s1774_s2 + $0x10] sm:$0xff]  ;;  %v313_v17 = vld [vmem:[%s1774_s2 + $0x18] sm:$0xff]  ;;  %v315_v18 = vld [vmem:[%s1774_s2 + $0x28] sm:$0xff] }
  0x19   : > { %v1262_v19 = vld [vmem:[%s1513_s21 + $0x18] sm:$0xff]  ;;  %v311_v20 = vld [vmem:[%s1774_s2 + $0x8] sm:$0xff]  ;;  %v581_v21 = vld [vmem:[%s1776_s4 + $0x70] sm:$0xff] }
  0x1a   : > { %v310_v22 = vld [vmem:[%s1774_s2] sm:$0xff]  ;;  %v1261_v23 = vld [vmem:[%s1513_s21 + $0x10] sm:$0xff]  ;;  %v580_v25 = vld [vmem:[%s1776_s4 + $0x68] sm:$0xff] }
  0x1b   : > { %v579_v24 = vld [vmem:[%s1776_s4 + $0x60] sm:$0xff]  ;;  %v582_v26 = vld [vmem:[%s1776_s4 + $0x78] sm:$0xff]  ;;  %v1260_v27 = vld [vmem:[%s1513_s21 + $0x8] sm:$0xff] }
  0x1c   : > { %v578_v28 = vld [vmem:[%s1776_s4 + $0x58] sm:$0xff]  ;;  %v575_v29 = vld [vmem:[%s1776_s4 + $0x40] sm:$0xff]  ;;  %v577_v30 = vld [vmem:[%s1776_s4 + $0x50] sm:$0xff] }
  0x1d   : > { %403 = vperm.xlu0 %1347, %v325_v4   ;;  %393 = vperm.xlu1 %1348, %v323_v5   ;;  %v1259_v31 = vld [vmem:[%s1513_s21] sm:$0xff]  ;;  %v573_v32 = vld [vmem:[%s1776_s4 + $0x30] sm:$0xff]  ;;  %v574_v33 = vld [vmem:[%s1776_s4 + $0x38] sm:$0xff]  ;;  %s1364_s21 = sshra.s32 %s1069_s17, 4  ;;  %s1365_s21 = int_to_ptr.hbm [resolvable:$true] %s1364_s21 }
  0x1e   : > { %v576_v34 = vld [vmem:[%s1776_s4 + $0x48] sm:$0xff]  ;;  %v1267_v35 = vld [vmem:[%s1773_s1] sm:$0xff]  ;;  %v569_v38 = vld [vmem:[%s1776_s4 + $0x10] sm:$0xff]  ;;  %s1366_s19 = scalar_lea.hbm %s1365_s21, 1  ;;  %p1371_p0 = scmp.lt.s32.totalorder %s1365_s21, %s1779_s7 }
  0x1f   : > { %503 = vmatpush.bf16.xpose.msra.mxu0 %v1265_v7  ;;  %1292 = vmatpush.bf16.xpose.msra.mxu3 %v1265_v7  ;;  %v1272_v36 = vld [vmem:[%s1773_s1 + $0x28] sm:$0xff]  ;;  %v571_v39 = vld [vmem:[%s1776_s4 + $0x20] sm:$0xff]  ;;  %v570_v42 = vld [vmem:[%s1776_s4 + $0x18] sm:$0xff]  ;;  %p1367_p11 = scmp.ne.s32.totalorder %s1365_s21, %s1366_s19  ;;  %p1372_p1 = scmp.lt.s32.totalorder %s1370_s28, %s1366_s19 }
  0x20   : > { %383 = vperm.xlu2 %1349, %v321_v10   ;;  %v572_v37 = vld [vmem:[%s1776_s4 + $0x28] sm:$0xff]  ;;  %v567_v40 = vld [vmem:[%s1776_s4] sm:$0xff]  ;;  %v1273_v44 = vld [vmem:[%s1773_s1 + $0x30] sm:$0xff] }
  0x21   : > { %v568_v41 = vld [vmem:[%s1776_s4 + $0x8] sm:$0xff]  ;;  %v802_v46 = vld [vmem:[%s1778_s6 + $0x10] sm:$0xff]  ;;  %v800_v47 = vld [vmem:[%s1778_s6] sm:$0xff]  ;;  %p1368_p12 = pnand %p1367_p11, %p1493_p5  ;;  %p1373_p2 = por %p1372_p1, %p1371_p0 }
  0x22   : > { %v1268_v43 = vld [vmem:[%s1773_s1 + $0x8] sm:$0xff]  ;;  %v804_v48 = vld [vmem:[%s1778_s6 + $0x20] sm:$0xff]  ;;  %v803_v50 = vld [vmem:[%s1778_s6 + $0x18] sm:$0xff] }
  0x23   : > { %v801_v45 = vld [vmem:[%s1778_s6 + $0x8] sm:$0xff]  ;;  %v1269_v51 = vld [vmem:[%s1773_s1 + $0x10] sm:$0xff]  ;;  %v1274_v52 = vld [vmem:[%s1773_s1 + $0x38] sm:$0xff]  ;;  %p1369_p13 = pneg %p1368_p12 }
  0x24   : > { %v805_v49 = vld [vmem:[%s1778_s6 + $0x28] sm:$0xff]  ;;  %v807_v53 = vld [vmem:[%s1778_s6 + $0x38] sm:$0xff]  ;;  %v808_v54 = vld [vmem:[%s1778_s6 + $0x40] sm:$0xff] }
  0x25   : > { %368 = vperm.xlu0 %1347, %v318_v8   ;;  %373 = vperm.xlu1 %1348, %v319_v9   ;;  %v806_v55 = vld [vmem:[%s1778_s6 + $0x30] sm:$0xff]  ;;  %v811_v57 = vld [vmem:[%s1778_s6 + $0x58] sm:$0xff]  ;;  %v809_v58 = vld [vmem:[%s1778_s6 + $0x48] sm:$0xff]  ;;  %p1374_p3 = pnand %p1373_p2, %p1369_p13 }
  0x26   : > { %v810_v56 = vld [vmem:[%s1778_s6 + $0x50] sm:$0xff]  ;;  %v1270_v59 = vld [vmem:[%s1773_s1 + $0x18] sm:$0xff]  ;;  %v813_v60 = vld [vmem:[%s1778_s6 + $0x68] sm:$0xff] }
  0x27   : > { %504 = vmatpush.bf16.xpose.msra.mxu0 %v1264_v11  ;;  %1293 = vmatpush.bf16.xpose.msra.mxu3 %v1264_v11  ;;  %v814_v61 = vld [vmem:[%s1778_s6 + $0x70] sm:$0xff]  ;;  %v812_v62 = vld [vmem:[%s1778_s6 + $0x60] sm:$0xff]  ;;  %v815_v63 = vld [vmem:[%s1778_s6 + $0x78] sm:$0xff] }
  0x28   : > { %358 = vperm.xlu2 %1349, %v316_v14   ;;  %v1271_v0 = vld [vmem:[%s1773_s1 + $0x20] sm:$0xff] }
  0x2d   : > { %363 = vperm.xlu0 %1347, %v317_v12   ;;  %348 = vperm.xlu1 %1348, %v314_v13  }
  0x2f   : > { %505 = vmatpush.bf16.xpose.msra.mxu0 %v1263_v15  ;;  %1294 = vmatpush.bf16.xpose.msra.mxu3 %v1263_v15 }
  0x30   : > { %353 = vperm.xlu2 %1349, %v315_v18  }
  0x35   : > { %338 = vperm.xlu0 %1347, %v312_v16   ;;  %343 = vperm.xlu1 %1348, %v313_v17  }
  0x37   : > { %506 = vmatpush.bf16.xpose.msra.mxu0 %v1262_v19  ;;  %1295 = vmatpush.bf16.xpose.msra.mxu3 %v1262_v19 }
  0x38   : > { %328 = vperm.xlu2 %1349, %v310_v22  }
  0x3d   : > { %333 = vperm.xlu0 %1347, %v311_v20   ;;  %679 = vperm.xlu1 %1348, %v581_v21  }
  0x3f   : > { %507 = vmatpush.bf16.xpose.msra.mxu0 %v1261_v23  ;;  %1296 = vmatpush.bf16.xpose.msra.mxu3 %v1261_v23 }
  0x40   : > { %684 = vperm.xlu2 %1349, %v582_v26  }
  0x45   : > { %669 = vperm.xlu0 %1347, %v579_v24   ;;  %674 = vperm.xlu1 %1348, %v580_v25  }
  0x47   : > { %508 = vmatpush.bf16.xpose.msra.mxu0 %v1260_v27  ;;  %1297 = vmatpush.bf16.xpose.msra.mxu3 %v1260_v27 }
  0x48   : > { %659 = vperm.xlu2 %1349, %v577_v30  }
  0x4d   : > { %664 = vperm.xlu0 %1347, %v578_v28   ;;  %649 = vperm.xlu1 %1348, %v575_v29  }
  0x4f   : > { %509 = vmatpush.bf16.xpose.msra.mxu0 %v1259_v31  ;;  %1298 = vmatpush.bf16.xpose.msra.mxu3 %v1259_v31 }
  0x50   : > { %654 = vperm.xlu2 %1349, %v576_v34  }
  0x55   : > { %639 = vperm.xlu0 %1347, %v573_v32   ;;  %644 = vperm.xlu1 %1348, %v574_v33  }
  0x56   : > { %510 = vmatmul.bf16.vlgmr.msra.gmra.mxu0 %v1267_v35  ;;  %535 = vmatmul.bf16.vlgmr.msra.gmra.mxu3 %v1272_v36 }
  0x58   : > { %629 = vperm.xlu2 %1349, %v571_v39  }
  0x5d   : > { %634 = vperm.xlu0 %1347, %v572_v37   ;;  %619 = vperm.xlu1 %1348, %v569_v38  }
  0x60   : > { %624 = vperm.xlu2 %1349, %v570_v42  }
  0x65   : > { %609 = vperm.xlu0 %1347, %v567_v40   ;;  %614 = vperm.xlu1 %1348, %v568_v41  }
  0x66   : > { %515 = vmatmul.bf16.gmra.mxu0 %v1268_v43  ;;  %540 = vmatmul.bf16.gmra.mxu3 %v1273_v44 }
  0x68   : > { %842 = vperm.xlu2 %1349, %v800_v47  }
  0x6d   : > { %847 = vperm.xlu0 %1347, %v801_v45   ;;  %852 = vperm.xlu1 %1348, %v802_v46  }
  0x70   : > { %857 = vperm.xlu2 %1349, %v803_v50  }
  0x72   : > { %v379_v2 = vpop.permute.xlu2 %378 }
  0x75   : > { %862 = vperm.xlu0 %1347, %v804_v48   ;;  %867 = vperm.xlu1 %1348, %v805_v49  }
  0x76   : > { %520 = vmatmul.bf16.gmra.mxu0 %v1269_v51  ;;  %545 = vmatmul.bf16.gmra.mxu3 %v1274_v52 }
  0x78   : > { %872 = vperm.xlu2 %1349, %v806_v55  }
  0x7a   : > { %v384_v4 = vpop.permute.xlu2 %383 }
  0x7d   : > { %877 = vperm.xlu0 %1347, %v807_v53   ;;  %882 = vperm.xlu1 %1348, %v808_v54  }
  0x80   : > { %887 = vperm.xlu2 %1349, %v809_v58  }
  0x82   : > { %v359_v6 = vpop.permute.xlu2 %358 }
  0x85   : > { %892 = vperm.xlu0 %1347, %v810_v56   ;;  %897 = vperm.xlu1 %1348, %v811_v57  }
  0x86   : > { %525 = vmatmul.bf16.gmra.mxu0 %v1270_v59 }
  0x87   : > { %v399_v1 = vpop.permute.xlu0 %398  ;;  %v389_v26 = vpop.permute.xlu1 %388 }
  0x88   : > { %902 = vperm.xlu2 %1349, %v812_v62  }
  0x8a   : > { %v354_v8 = vpop.permute.xlu2 %353 }
  0x8d   : > { %907 = vperm.xlu0 %1347, %v813_v60   ;;  %912 = vperm.xlu1 %1348, %v814_v61  }
  0x8f   : > { %v404_v3 = vpop.permute.xlu0 %403  ;;  %v394_v30 = vpop.permute.xlu1 %393 }
  0x90   : > { %917 = vperm.xlu2 %1349, %v815_v63  }
  0x92   : > { %v329_v11 = vpop.permute.xlu2 %328 }
  0x96   : > { %530 = vmatmul.bf16.gmra.mxu0 %v1271_v0 }
  0x97   : > { %v369_v5 = vpop.permute.xlu0 %368  ;;  %v374_v48 = vpop.permute.xlu1 %373 }
  0x9f   : > { %v364_v7 = vpop.permute.xlu0 %363  ;;  %v349_v50 = vpop.permute.xlu1 %348 }
  0xa7   : > { %v1685_v9 = vpop.permute.xlu0 %338  ;;  %v344_v63 = vpop.permute.xlu1 %343 }
  0xaf   : > { %v334_v14 = vpop.permute.xlu0 %333 }
  0xd3   : > { %v511_v10 = vpop.f32.mrf.mxu0 }
  0xd4   : > { %v512_v13 = vadd.f32 %v511_v10, %v329_v11  ;;  %v1275_v10 = vld [vmem:[%s1775_s3] sm:$0xff]  ;;  %v1282_v11 = vld [vmem:[%s1775_s3 + $0x38] sm:$0xff] }
  0xd6   : > { %v583_v17 = vmax.f32 %v512_v13, 0.0  ;;  %v1278_v13 = vld [vmem:[%s1775_s3 + $0x18] sm:$0xff] }
  0xd9   : > { %v536_v12 = vpop.f32.mrf.mxu3 }
  0xda   : > { %v537_v38 = vadd.f32 %v536_v12, %v379_v2  ;;  %v1277_v12 = vld [vmem:[%s1775_s3 + $0x10] sm:$0xff] }
  0xdb   : > { %v513_v15 = vpop.f32.mrf.mxu0 }
  0xdc   : > { %v514_v16 = vadd.f32 %v513_v15, %v334_v14  ;;  %v593_v43 = vmax.f32 %v537_v38, 0.0  ;;  %v1279_v14 = vld [vmem:[%s1775_s3 + $0x20] sm:$0xff]  ;;  %v1280_v15 = vld [vmem:[%s1775_s3 + $0x28] sm:$0xff] }
  0xde   : > { %v584_v18 = vmax.f32 %v514_v16, 0.0  ;;  %v680_v16 = vpop.permute.xlu1 %679 }
  0xe0   : > { %v1687_v19 = vpack.c.bf16 %v584_v18, %v583_v17  ;;  %v670_v17 = vpop.permute.xlu0 %669  ;;  %v1281_v18 = vld [vmem:[%s1775_s3 + $0x30] sm:$0xff] }
  0xe1   : > { %v538_v20 = vpop.f32.mrf.mxu3 }
  0xe2   : > { %v539_v39 = vadd.f32 %v538_v20, %v384_v4 }
  0xe3   : > { %v516_v21 = vpop.f32.mrf.mxu0 }
  0xe4   : > { %v594_v44 = vmax.f32 %v539_v39, 0.0 }
  0xe6   : > { %v604_v47 = vpack.c.bf16 %v594_v44, %v593_v43 }
  0xe8   : > { %v665_v20 = vpop.permute.xlu0 %664 }
  0xe9   : > { %v541_v22 = vpop.f32.mrf.mxu3 }
  0xea   : > { %v542_v32 = vadd.f32 %v541_v22, %v389_v26  ;;  %v685_v22 = vpop.permute.xlu2 %684 }
  0xeb   : > { %v518_v23 = vpop.f32.mrf.mxu0 }
  0xec   : > { %v595_v40 = vmax.f32 %v542_v32, 0.0  ;;  %v519_v0 = vadd.f32 %v518_v23, %v344_v63 }
  0xf0   : > { %v640_v23 = vpop.permute.xlu0 %639 }
  0xf1   : > { %v543_v24 = vpop.f32.mrf.mxu3 }
  0xf2   : > { %v544_v33 = vadd.f32 %v543_v24, %v394_v30 }
  0xf3   : > { %v521_v25 = vpop.f32.mrf.mxu0 }
  0xf4   : > { %v596_v41 = vmax.f32 %v544_v33, 0.0  ;;  %v522_v61 = vadd.f32 %v521_v25, %v349_v50  ;;  %v660_v25 = vpop.permute.xlu2 %659 }
  0xf6   : > { %v605_v45 = vpack.c.bf16 %v596_v41, %v595_v40  ;;  %v587_v4 = vmax.f32 %v522_v61, 0.0 }
  0xf8   : > { %v635_v26 = vpop.permute.xlu0 %634 }
  0xf9   : > { %v546_v27 = vpop.f32.mrf.mxu3 }
  0xfa   : > { %v547_v29 = vadd.f32 %v546_v27, %v399_v1 }
  0xfb   : > { %v523_v28 = vpop.f32.mrf.mxu0 }
  0xfc   : > { %v597_v34 = vmax.f32 %v547_v29, 0.0  ;;  %v524_v58 = vadd.f32 %v523_v28, %v354_v8  ;;  %v655_v29 = vpop.permute.xlu2 %654 }
  0xfe   : > { %v588_v1 = vmax.f32 %v524_v58, 0.0 }
 0x100   : > { %v610_v30 = vpop.permute.xlu0 %609 }
 0x101   : > { %v548_v31 = vpop.f32.mrf.mxu3 }
 0x102   : > { %v549_v35 = vadd.f32 %v548_v31, %v404_v3  ;;  %v517_v3 = vadd.f32 %v516_v21, %v1685_v9  ;;  %v1276_v9 = vld [vmem:[%s1775_s3 + $0x8] sm:$0xff] }
 0x103   : > { %v526_v36 = vpop.f32.mrf.mxu0 }
 0x104   : > { %v598_v37 = vmax.f32 %v549_v35, 0.0  ;;  %v527_v55 = vadd.f32 %v526_v36, %v359_v6  ;;  %v601_v6 = vpack.c.bf16 %v588_v1, %v587_v4  ;;  %v630_v40 = vpop.permute.xlu2 %629 }
 0x106   : > { %v606_v42 = vpack.c.bf16 %v598_v37, %v597_v34  ;;  %v589_v62 = vmax.f32 %v527_v55, 0.0 }
 0x108   : > { %735 = vmatpush.bf16.msra.mxu1 %v606_v42  ;;  %1299 = vmatpush.bf16.msrb.mxu3 %v606_v42 }
 0x10b   : > { %v528_v46 = vpop.f32.mrf.mxu0 }
 0x10c   : > { %736 = vmatpush.bf16.msra.mxu1 %v605_v45  ;;  %1300 = vmatpush.bf16.msrb.mxu3 %v605_v45  ;;  %v529_v53 = vadd.f32 %v528_v46, %v364_v7  ;;  %v585_v7 = vmax.f32 %v517_v3, 0.0 }
 0x10e   : > { %v590_v59 = vmax.f32 %v529_v53, 0.0 }
 0x110   : > { %737 = vmatpush.bf16.msra.mxu1 %v604_v47  ;;  %1301 = vmatpush.bf16.msrb.mxu3 %v604_v47  ;;  %v602_v2 = vpack.c.bf16 %v590_v59, %v589_v62 }
 0x113   : > { %v531_v49 = vpop.f32.mrf.mxu0 }
 0x114   : > { %v532_v51 = vadd.f32 %v531_v49, %v369_v5  ;;  %v586_v5 = vmax.f32 %v519_v0, 0.0 }
 0x116   : > { %v591_v56 = vmax.f32 %v532_v51, 0.0  ;;  %v600_v8 = vpack.c.bf16 %v586_v5, %v585_v7 }
 0x11b   : > { %v533_v52 = vpop.f32.mrf.mxu0 }
 0x11c   : > { %v534_v54 = vadd.f32 %v533_v52, %v374_v48  ;;  %v625_v48 = vpop.permute.xlu2 %624 }
 0x11e   : > { %v592_v57 = vmax.f32 %v534_v54, 0.0 }
 0x120   : > { %v603_v60 = vpack.c.bf16 %v592_v57, %v591_v56 }
 0x122   : > { %738 = vmatpush.bf16.msra.mxu1 %v603_v60  ;;  %1302 = vmatpush.bf16.msrb.mxu3 %v603_v60 }
 0x126   : > { %739 = vmatpush.bf16.msra.mxu1 %v602_v2  ;;  %1303 = vmatpush.bf16.msrb.mxu3 %v602_v2 }
 0x12a   : > { %740 = vmatpush.bf16.msra.mxu1 %v601_v6  ;;  %1304 = vmatpush.bf16.msrb.mxu3 %v601_v6 }
 0x12e   : > { %741 = vmatpush.bf16.msra.mxu1 %v600_v8  ;;  %1305 = vmatpush.bf16.msrb.mxu3 %v600_v8 }
 0x132   : > { %742 = vmatpush.bf16.msra.mxu1 %v1687_v19  ;;  %1306 = vmatpush.bf16.msrb.mxu3 %v1687_v19  ;;  %v675_v19 = vpop.permute.xlu1 %674 }
 0x135   : > { %743 = vmatmul.bf16.vlgmr.msra.gmra.mxu1 %v1275_v10  ;;  %778 = vmatmul.bf16.vlgmr.msrb.gmra.mxu3 %v1282_v11 }
 0x13a   : > { %v650_v21 = vpop.permute.xlu1 %649 }
 0x142   : > { %v645_v24 = vpop.permute.xlu1 %644 }
 0x145   : > { %748 = vmatmul.bf16.gmra.mxu1 %v1276_v9 }
 0x14a   : > { %v620_v27 = vpop.permute.xlu1 %619 }
 0x152   : > { %v615_v33 = vpop.permute.xlu1 %614 }
 0x155   : > { %753 = vmatmul.bf16.gmra.mxu1 %v1277_v12 }
 0x165   : > { %758 = vmatmul.bf16.gmra.mxu1 %v1278_v13 }
 0x175   : > { %763 = vmatmul.bf16.gmra.mxu1 %v1279_v14 }
 0x185   : > { %768 = vmatmul.bf16.gmra.mxu1 %v1280_v15 }
 0x195   : > { %773 = vmatmul.bf16.gmra.mxu1 %v1281_v18 }
 0x1b2   : > { %v744_v28 = vpop.f32.mrf.mxu1 }
 0x1b3   : > { %v745_v32 = vadd.f32 %v744_v28, %v610_v30 }
 0x1b5   : > { %v816_v36 = vmax.f32 %v745_v32, 0.0  ;;  %v1290_v32 = vld [vmem:[%s1777_s5 + $0x38] sm:$0xff] }
 0x1b8   : > { %v779_v31 = vpop.f32.mrf.mxu3 }
 0x1b9   : > { %v780_v38 = vadd.f32 %v779_v31, %v680_v16  ;;  %v1289_v31 = vld [vmem:[%s1777_s5 + $0x30] sm:$0xff] }
 0x1ba   : > { %v746_v34 = vpop.f32.mrf.mxu1 }
 0x1bb   : > { %v747_v35 = vadd.f32 %v746_v34, %v615_v33  ;;  %v830_v44 = vmax.f32 %v780_v38, 0.0  ;;  %v843_v34 = vpop.permute.xlu2 %842 }
 0x1bd   : > { %v817_v37 = vmax.f32 %v747_v35, 0.0 }
 0x1bf   : > { %v832_v39 = vpack.c.bf16 %v817_v37, %v816_v36  ;;  %v848_v36 = vpop.permute.xlu0 %847 }
 0x1c0   : > { %v781_v41 = vpop.f32.mrf.mxu3 }
 0x1c1   : > { %v782_v42 = vadd.f32 %v781_v41, %v685_v22 }
 0x1c2   : > { %v749_v43 = vpop.f32.mrf.mxu1 }
 0x1c3   : > { %v831_v45 = vmax.f32 %v782_v42, 0.0  ;;  %v750_v47 = vadd.f32 %v749_v43, %v620_v27  ;;  %v853_v42 = vpop.permute.xlu1 %852 }
 0x1c5   : > { %v839_v46 = vpack.c.bf16 %v831_v45, %v830_v44  ;;  %v818_v51 = vmax.f32 %v750_v47, 0.0  ;;  %v858_v47 = vpop.permute.xlu2 %857 }
 0x1c7   : > { %968 = vmatpush.bf16.msra.mxu2 %v839_v46 }
 0x1ca   : > { %v751_v49 = vpop.f32.mrf.mxu1 }
 0x1cb   : > { %v752_v50 = vadd.f32 %v751_v49, %v625_v48 }
 0x1cd   : > { %v819_v52 = vmax.f32 %v752_v50, 0.0 }
 0x1cf   : > { %v833_v53 = vpack.c.bf16 %v819_v52, %v818_v51  ;;  %v863_v52 = vpop.permute.xlu0 %862 }
 0x1d2   : > { %v754_v54 = vpop.f32.mrf.mxu1 }
 0x1d3   : > { %v755_v55 = vadd.f32 %v754_v54, %v630_v40 }
 0x1d5   : > { %v820_v58 = vmax.f32 %v755_v55, 0.0 }
 0x1da   : > { %v756_v56 = vpop.f32.mrf.mxu1 }
 0x1db   : > { %v757_v57 = vadd.f32 %v756_v56, %v635_v26 }
 0x1dd   : > { %v821_v59 = vmax.f32 %v757_v57, 0.0 }
 0x1df   : > { %v834_v60 = vpack.c.bf16 %v821_v59, %v820_v58 }
 0x1e2   : > { %v759_v61 = vpop.f32.mrf.mxu1 }
 0x1e3   : > { %v760_v26 = vadd.f32 %v759_v61, %v640_v23  ;;  %v1285_v23 = vld [vmem:[%s1777_s5 + $0x10] sm:$0xff] }
 0x1e5   : > { %v822_v30 = vmax.f32 %v760_v26, 0.0 }
 0x1ea   : > { %v761_v62 = vpop.f32.mrf.mxu1 }
 0x1eb   : > { %v762_v16 = vadd.f32 %v761_v62, %v645_v24  ;;  %v1286_v24 = vld [vmem:[%s1777_s5 + $0x18] sm:$0xff] }
 0x1ed   : > { %v823_v28 = vmax.f32 %v762_v16, 0.0 }
 0x1f2   : > { %v764_v63 = vpop.f32.mrf.mxu1 }
 0x1f3   : > { %v765_v14 = vadd.f32 %v764_v63, %v650_v21  ;;  %v1284_v21 = vld [vmem:[%s1777_s5 + $0x8] sm:$0xff]  ;;  %v868_v63 = vpop.permute.xlu1 %867 }
 0x1f5   : > { %v824_v27 = vmax.f32 %v765_v14, 0.0 }
 0x1fa   : > { %v766_v0 = vpop.f32.mrf.mxu1 }
 0x1fb   : > { %v767_v9 = vadd.f32 %v766_v0, %v655_v29  ;;  %v1288_v29 = vld [vmem:[%s1777_s5 + $0x28] sm:$0xff] }
 0x1fd   : > { %v825_v18 = vmax.f32 %v767_v9, 0.0 }
 0x202   : > { %v769_v1 = vpop.f32.mrf.mxu1 }
 0x203   : > { %v770_v8 = vadd.f32 %v769_v1, %v660_v25  ;;  %v1287_v25 = vld [vmem:[%s1777_s5 + $0x20] sm:$0xff]  ;;  %v873_v1 = vpop.permute.xlu2 %872 }
 0x205   : > { %v826_v15 = vmax.f32 %v770_v8, 0.0 }
 0x20a   : > { %v771_v2 = vpop.f32.mrf.mxu1 }
 0x20b   : > { %v772_v6 = vadd.f32 %v771_v2, %v665_v20  ;;  %v1283_v20 = vld [vmem:[%s1777_s5] sm:$0xff]  ;;  %v878_v2 = vpop.permute.xlu0 %877 }
 0x20d   : > { %v827_v12 = vmax.f32 %v772_v6, 0.0 }
 0x20f   : > { %v837_v22 = vpack.c.bf16 %v827_v12, %v826_v15 }
 0x212   : > { %v774_v3 = vpop.f32.mrf.mxu1 }
 0x213   : > { %v775_v4 = vadd.f32 %v774_v3, %v670_v17  ;;  %v836_v17 = vpack.c.bf16 %v825_v18, %v824_v27  ;;  %v883_v3 = vpop.permute.xlu1 %882 }
 0x215   : > { %v828_v10 = vmax.f32 %v775_v4, 0.0 }
 0x21a   : > { %v776_v5 = vpop.f32.mrf.mxu1 }
 0x21b   : > { %v777_v7 = vadd.f32 %v776_v5, %v675_v19  ;;  %v835_v19 = vpack.c.bf16 %v823_v28, %v822_v30 }
 0x21d   : > { %v829_v11 = vmax.f32 %v777_v7, 0.0  ;;  %v888_v7 = vpop.permute.xlu2 %887 }
 0x21f   : > { %v838_v13 = vpack.c.bf16 %v829_v11, %v828_v10  ;;  %v893_v11 = vpop.permute.xlu0 %892 }
 0x221   : > { %969 = vmatpush.bf16.msra.mxu2 %v838_v13  ;;  %v898_v13 = vpop.permute.xlu1 %897 }
 0x225   : > { %970 = vmatpush.bf16.msra.mxu2 %v837_v22 }
 0x229   : > { %971 = vmatpush.bf16.msra.mxu2 %v836_v17 }
 0x22d   : > { %972 = vmatpush.bf16.msra.mxu2 %v835_v19  ;;  %v903_v19 = vpop.permute.xlu2 %902 }
 0x231   : > { %973 = vmatpush.bf16.msra.mxu2 %v834_v60 }
 0x235   : > { %974 = vmatpush.bf16.msra.mxu2 %v833_v53 }
 0x239   : > { %975 = vmatpush.bf16.msra.mxu2 %v832_v39 }
 0x23c   : > { %976 = vmatmul.bf16.vlgmr.msra.gmra.mxu2 %v1283_v20 }
 0x24c   : > { %981 = vmatmul.bf16.gmra.mxu2 %v1284_v21 }
 0x25c   : > { %986 = vmatmul.bf16.gmra.mxu2 %v1285_v23 }
 0x26c   : > { %991 = vmatmul.bf16.gmra.mxu2 %v1286_v24  ;;  %v908_v24 = vpop.permute.xlu0 %907 }
 0x27c   : > { %996 = vmatmul.bf16.gmra.mxu2 %v1287_v25 }
 0x28c   : > { %1001 = vmatmul.bf16.gmra.mxu2 %v1288_v29 }
 0x29c   : > { %1006 = vmatmul.bf16.gmra.mxu2 %v1289_v31 }
 0x2ac   : > { %1011 = vmatmul.bf16.gmra.mxu2 %v1290_v32 }
 0x2bf   : > { %v977_v33 = vpop.f32.mrf.mxu2 }
 0x2c0   : > { %v978_v35 = vadd.f32 %v977_v33, %v843_v34  ;;  %v913_v33 = vpop.permute.xlu1 %912 }
 0x2c2   : > { %v1017_v39 = vmul.f32 %v978_v35, %v978_v35 }
 0x2c7   : > { %v979_v37 = vpop.f32.mrf.mxu2 }
 0x2c8   : > { %v980_v38 = vadd.f32 %v979_v37, %v848_v36 }
 0x2ca   : > { %v1018_v40 = vmul.f32 %v980_v38, %v980_v38 }
 0x2cc   : > { %v1033_v41 = vadd.f32 %v1018_v40, %v1017_v39 }
 0x2cf   : > { %v982_v43 = vpop.f32.mrf.mxu2 }
 0x2d0   : > { %v983_v44 = vadd.f32 %v982_v43, %v853_v42 }
 0x2d2   : > { %v1019_v45 = vmul.f32 %v983_v44, %v983_v44 }
 0x2d4   : > { %v1034_v46 = vadd.f32 %v1033_v41, %v1019_v45  ;;  %v918_v41 = vpop.permute.xlu2 %917 }
 0x2d7   : > { %v984_v48 = vpop.f32.mrf.mxu2 }
 0x2d8   : > { %v985_v49 = vadd.f32 %v984_v48, %v858_v47 }
 0x2da   : > { %v1020_v50 = vmul.f32 %v985_v49, %v985_v49 }
 0x2dc   : > { %v1035_v51 = vadd.f32 %v1034_v46, %v1020_v50 }
 0x2df   : > { %v987_v53 = vpop.f32.mrf.mxu2 }
 0x2e0   : > { %v988_v54 = vadd.f32 %v987_v53, %v863_v52 }
 0x2e2   : > { %v1021_v55 = vmul.f32 %v988_v54, %v988_v54 }
 0x2e4   : > { %v1036_v56 = vadd.f32 %v1035_v51, %v1021_v55 }
 0x2e7   : > { %v989_v57 = vpop.f32.mrf.mxu2 }
 0x2e8   : > { %v990_v5 = vadd.f32 %v989_v57, %v868_v63 }
 0x2ea   : > { %v1022_v8 = vmul.f32 %v990_v5, %v990_v5 }
 0x2ec   : > { %v1037_v15 = vadd.f32 %v1036_v56, %v1022_v8 }
 0x2ef   : > { %v992_v58 = vpop.f32.mrf.mxu2 }
 0x2f0   : > { %v993_v6 = vadd.f32 %v992_v58, %v873_v1 }
 0x2f2   : > { %v1023_v9 = vmul.f32 %v993_v6, %v993_v6 }
 0x2f4   : > { %v1038_v22 = vadd.f32 %v1037_v15, %v1023_v9 }
 0x2f7   : > { %v994_v59 = vpop.f32.mrf.mxu2 }
 0x2f8   : > { %v995_v10 = vadd.f32 %v994_v59, %v878_v2 }
 0x2fa   : > { %v1024_v16 = vmul.f32 %v995_v10, %v995_v10 }
 0x2fc   : > { %v1039_v28 = vadd.f32 %v1038_v22, %v1024_v16 }
 0x2ff   : > { %v997_v60 = vpop.f32.mrf.mxu2 }
 0x300   : > { %v998_v12 = vadd.f32 %v997_v60, %v883_v3 }
 0x302   : > { %v1025_v26 = vmul.f32 %v998_v12, %v998_v12 }
 0x304   : > { %v1040_v20 = vadd.f32 %v1039_v28, %v1025_v26 }
 0x307   : > { %v999_v61 = vpop.f32.mrf.mxu2 }
 0x308   : > { %v1000_v18 = vadd.f32 %v999_v61, %v888_v7 }
 0x30a   : > { %v1026_v17 = vmul.f32 %v1000_v18, %v1000_v18 }
 0x30c   : > { %v1041_v29 = vadd.f32 %v1040_v20, %v1026_v17 }
 0x30f   : > { %v1002_v62 = vpop.f32.mrf.mxu2 }
 0x310   : > { %v1003_v27 = vadd.f32 %v1002_v62, %v893_v11 }
 0x312   : > { %v1027_v21 = vmul.f32 %v1003_v27, %v1003_v27 }
 0x314   : > { %v1042_v34 = vadd.f32 %v1041_v29, %v1027_v21 }
 0x317   : > { %v1004_v0 = vpop.f32.mrf.mxu2 }
 0x318   : > { %v1005_v30 = vadd.f32 %v1004_v0, %v898_v13 }
 0x31a   : > { %v1028_v31 = vmul.f32 %v1005_v30, %v1005_v30 }
 0x31c   : > { %v1043_v37 = vadd.f32 %v1042_v34, %v1028_v31 }
 0x31f   : > { %v1007_v4 = vpop.f32.mrf.mxu2 }
 0x320   : > { %v1008_v23 = vadd.f32 %v1007_v4, %v903_v19 }
 0x322   : > { %v1029_v35 = vmul.f32 %v1008_v23, %v1008_v23 }
 0x324   : > { %v1044_v39 = vadd.f32 %v1043_v37, %v1029_v35 }
 0x327   : > { %v1009_v14 = vpop.f32.mrf.mxu2 }
 0x328   : > { %v1010_v32 = vadd.f32 %v1009_v14, %v908_v24 }
 0x32a   : > { %v1030_v38 = vmul.f32 %v1010_v32, %v1010_v32 }
 0x32c   : > { %v1045_v43 = vadd.f32 %v1044_v39, %v1030_v38 }
 0x32f   : > { %v1012_v25 = vpop.f32.mrf.mxu2 }
 0x330   : > { %v1013_v36 = vadd.f32 %v1012_v25, %v913_v33 }
 0x332   : > { %v1031_v40 = vmul.f32 %v1013_v36, %v1013_v36 }
 0x334   : > { %v1046_v45 = vadd.f32 %v1045_v43, %v1031_v40 }
 0x337   : > { %v1014_v42 = vpop.f32.mrf.mxu2 }
 0x338   : > { %v1015_v44 = vadd.f32 %v1014_v42, %v918_v41 }
 0x33a   : > { %v1032_v46 = vmul.f32 %v1015_v44, %v1015_v44 }
 0x33c   : > { %v1047_v47 = vadd.f32 %v1046_v45, %v1032_v46 }
 0x33e   : > { %v1048_v48 = vrot.slane %v1047_v47, 4 }
 0x340   : > { %v1049_v49 = vadd.f32 %v1048_v48, %v1047_v47 }
 0x342   : > { %v1050_v50 = vrot.slane %v1049_v49, 2 }
 0x344   : > { %v1051_v51 = vadd.f32 %v1050_v50, %v1049_v49 }
 0x346   : > { %v1052_v52 = vrot.slane %v1051_v51, 1 }
 0x348   : > { %v1053_v53 = vadd.f32 %v1052_v52, %v1051_v51 }
 0x34a   : > { %1054 = vst [vmem:[%s271_s15] sm:$0x1] %v1053_v53 }
 0x34b   : > { %1377 = shalt.err (!%p1374_p3)
}
 0x34c   : > { %1307 = dma.vmem_to_hbm [thread:$0]  (%p1493_p5), %s1067_s16, 16, %s1069_s17, %s1056_s18  }
 0x34d PF: > { %p1313_p4 = scmp.ge.s32.totalorder %s1412_s27, 2  ;;  %s1080_s8 = sand.u32 1, %s1400_s24  }
 0x34e   : > { %s1081_s9 = scalar_lea.sflag [#allocation3], %s1080_s8 }
 0x34f   : > { %p1310_p7 = pnand %p1313_p4, %p1497_p6 }
 0x351   : > { %p1311_p8 = pneg %p1310_p7 }
 0x353   : > { %1395 = dma.done.wait (%p1311_p8), %s1081_s9, 16  }
 0x354   : > { %1397 = vsyncadd (%p1311_p8), %s1081_s9, 4294967280  ;;  %p17_p9 = scmp.ge.s32.totalorder %s1480_s30, 4   ;;  %s1782_s24 = smov %s1404_s25 }
 0x355   : > { %s1783_s25 = smov %s1408_s26  ;;  %s1784_s26 = smov %s1491_s10 }
 0x356   : > { %s1785_s27 = smov %s1480_s30  ;;  %19 = sbr.rel (!%p17_p9) target bundleno = 3 (0x3), region = 83 }
 0x35b   :  { %1086 = vsyncpa [#allocation3], 1 }
 0x35c   :  { %1088 = vsyncpa [#allocation3 + $0x1], 1 }

</bundles_post_ra>
